<compile_context>
chip_gen: v7x
topology: tpu7x:2x2x1
jax: 0.10.0
libtpu: 0.0.40
codegen_flags: <defaults>
</compile_context>

<pallas_src>
import jax
import jax.numpy as jnp
from jax.experimental import pallas as pl
from jax.experimental.pallas import tpu as pltpu

IN_FEATURES = 784
NUM_CLASSES = 10
PADDED_CLASSES = 128  # lane width


def _round_up(n, m):
    return ((n + m - 1) // m) * m


def _cdiv(n, m):
    return (n + m - 1) // m


def netlin_kernel(x_ref, w_ref, b_ref, o_ref):
    # x_ref: (tb, 784) f32    w_ref: (784, 128) bf16
    # b_ref: (1, 128) f32     o_ref: (tb, 128) f32
    # Cast x to bf16 in VMEM (no extra HBM traffic), matmul on the MXU with
    # f32 accumulation.
    x_bf = x_ref[...].astype(jnp.bfloat16)
    logits = (
        jnp.dot(x_bf, w_ref[...], preferred_element_type=jnp.float32)
        + b_ref[...]
    )  # (tb, 128) f32

    # Mask the 118 padded classes so they cannot contribute to max/sum.
    col = jax.lax.broadcasted_iota(jnp.int32, logits.shape, 1)
    logits = jnp.where(col < NUM_CLASSES, logits, jnp.float32(-1e30))

    # Numerically-stable log_softmax over the class axis, in f32, matching
    # F.log_softmax on a 2-D tensor (implicit dim=1).
    m = jnp.max(logits, axis=-1, keepdims=True)
    shifted = logits - m
    lse = jnp.log(jnp.sum(jnp.exp(shifted), axis=-1, keepdims=True))
    o_ref[...] = (shifted - lse).astype(o_ref.dtype)


def netlin_forward(x_nchw, weight, bias, *, tile_b=2048):
    """x_nchw: (B, C, H, W) with C*H*W == 784; weight: (10, 784); bias: (10,)."""
    B = x_nchw.shape[0]
    D = IN_FEATURES

    # Layout plumbing only (no wrapper-side cast of x: kernel reads f32).
    x_flat = x_nchw.reshape(B, -1).astype(jnp.float32)          # (B, 784) f32

    # Lane-dense class axis: pad W / bias to 128 classes (padded cols are 0;
    # the kernel masks their logits to -1e30 before the softmax).
    w_t = (
        jnp.zeros((D, PADDED_CLASSES), jnp.bfloat16)
        .at[:, :NUM_CLASSES].set(weight.T.astype(jnp.bfloat16))
    )
    b2 = (
        jnp.zeros((1, PADDED_CLASSES), jnp.float32)
        .at[:, :NUM_CLASSES].set(bias.astype(jnp.float32))
    )

    # Batch tile: multiple of 8 sublanes (f32 tiles); don't over-tile tiny
    # batches, and keep >= 2 grid steps when possible so v7x's two
    # TensorCores both get batch tiles.
    tb = min(tile_b, _round_up(B, 8))
    if B > 8 and _round_up(B, tb) // tb < 2:
        tb = _round_up(_cdiv(B, 2), 8)
    Bp = _round_up(B, tb)
    if Bp != B:
        # Zero-padded rows produce finite log-probs and are sliced off.
        x_flat = jnp.pad(x_flat, ((0, Bp - B), (0, 0)))

    grid = (Bp // tb,)

    cost = pl.CostEstimate(
        flops=2 * Bp * D * PADDED_CLASSES,
        bytes_accessed=(
            Bp * D * 4                               # x read, f32 (dominant)
            + D * PADDED_CLASSES * 2                 # W read, bf16
            + PADDED_CLASSES * 4                     # bias read
            + Bp * PADDED_CLASSES * 4                # output write
        ),
        transcendentals=Bp * (PADDED_CLASSES + 1),   # exp per lane + log
    )

    out = pl.pallas_call(
        netlin_kernel,
        out_shape=jax.ShapeDtypeStruct((Bp, PADDED_CLASSES), jnp.float32),
        grid=grid,
        in_specs=[
            # x: tiled along batch -> double-buffered prefetch/compute overlap.
            pl.BlockSpec((tb, D), lambda i: (i, 0)),
            # W and bias: constant index_map -> fetched once, VMEM-resident.
            pl.BlockSpec((D, PADDED_CLASSES), lambda i: (0, 0)),
            pl.BlockSpec((1, PADDED_CLASSES), lambda i: (0, 0)),
        ],
        out_specs=pl.BlockSpec((tb, PADDED_CLASSES), lambda i: (i, 0)),
        compiler_params=pltpu.CompilerParams(
            dimension_semantics=("parallel",),   # shard batch tiles across TCs
            vmem_limit_bytes=32 * 1024 * 1024,   # clears v5e's 16 MiB scoped default
        ),
        cost_estimate=cost,
    )(x_flat, w_t, b2)

    return out[:B, :NUM_CLASSES]


def init_params(key):
    # Deterministic init mimicking nn.Linear(784, 10) default:
    # U(-1/sqrt(in_features), 1/sqrt(in_features)) for both weight and bias.
    k_w, k_b = jax.random.split(key)
    bound = 1.0 / jnp.sqrt(784.0)
    weight = jax.random.uniform(
        k_w, (NUM_CLASSES, IN_FEATURES), jnp.float32, -bound, bound)
    bias = jax.random.uniform(k_b, (NUM_CLASSES,), jnp.float32, -bound, bound)
    return weight, bias


def _reference(x_nchw, weight, bias):
    logits = x_nchw.reshape(x_nchw.shape[0], -1) @ weight.T + bias
    return jax.nn.log_softmax(logits, axis=-1)


if __name__ == "__main__":
    key = jax.random.PRNGKey(0)
    k_x, k_p, k_x2 = jax.random.split(key, 3)

    weight, bias = init_params(k_p)

    # Small MNIST-like batch, NCHW: (B=2, C=1, H=28, W=28) -> 784 features.
    x = jax.random.normal(k_x, (2, 1, 28, 28), jnp.float32)
    out = jax.block_until_ready(netlin_forward(x, weight, bias))
    ref = _reference(x, weight, bias)
    assert out.shape == (2, NUM_CLASSES)
    # bf16 matmul inside the kernel -> looser tolerance vs pure-f32 reference.
    assert jnp.allclose(out, ref, atol=2e-2, rtol=2e-2), "batch=2 mismatch"

    # Also exercise the multi-step batch grid (padding + >1 tile, small tile).
    x2 = jax.random.normal(k_x2, (100, 1, 28, 28), jnp.float32)
    out2 = jax.block_until_ready(netlin_forward(x2, weight, bias, tile_b=32))
    ref2 = _reference(x2, weight, bias)
    assert out2.shape == (100, NUM_CLASSES)
    assert jnp.allclose(out2, ref2, atol=2e-2, rtol=2e-2), "batch=100 mismatch"

    # Default (large-tile) path with a non-tile-aligned batch: grid >= 2 tiles.
    out3 = jax.block_until_ready(netlin_forward(x2, weight, bias))
    assert out3.shape == (100, NUM_CLASSES)
    assert jnp.allclose(out3, ref2, atol=2e-2, rtol=2e-2), "default-tile mismatch"

    print("KERNEL_OK")
</pallas_src>

<mosaic_0001>
module attributes {stable_mosaic.version = 11 : i64} {
  func.func @netlin_kernel(%arg0: i32, %arg1: memref<8x784xf32, #tpu.memory_space<vmem>>, %arg2: memref<784x128xbf16, #tpu.memory_space<vmem>>, %arg3: memref<1x128xf32, #tpu.memory_space<vmem>>, %arg4: memref<8x128xf32, #tpu.memory_space<vmem>>) attributes {dimension_semantics = [#tpu.dimension_semantics<parallel>], iteration_bounds = array<i64: 1>, scalar_prefetch = 0 : i64, scratch_operands = 0 : i64, tpu.core_type = #tpu.core_type<tc>, window_params = [{transform_indices = @transform_0, window_bounds = array<i64: 8, 784>}, {pipeline_mode = #tpu.pipeline_mode<synchronous>, transform_indices = @transform_1, window_bounds = array<i64: 784, 128>}, {pipeline_mode = #tpu.pipeline_mode<synchronous>, transform_indices = @transform_2, window_bounds = array<i64: 1, 128>}, {transform_indices = @transform_3, window_bounds = array<i64: 8, 128>}]} {
    %c0 = arith.constant 0 : index
    %c0_0 = arith.constant 0 : index
    %0 = vector.load %arg1[%c0, %c0_0] : memref<8x784xf32, #tpu.memory_space<vmem>>, vector<8x784xf32>
    %1 = arith.truncf %0 : vector<8x784xf32> to vector<8x784xbf16>
    %c0_1 = arith.constant 0 : index
    %c0_2 = arith.constant 0 : index
    %2 = vector.load %arg2[%c0_1, %c0_2] : memref<784x128xbf16, #tpu.memory_space<vmem>>, vector<784x128xbf16>
    %cst = arith.constant dense<0.000000e+00> : vector<8x128xf32>
    %3 = tpu.matmul %1, %2, %cst {dimension_numbers = #tpu.dot_dimension_numbers<[1], [0], [0], [1], [0, 0, 1, 1], [], []>} : vector<8x784xbf16>, vector<784x128xbf16>, vector<8x128xf32> -> vector<8x128xf32>
    %c0_3 = arith.constant 0 : index
    %c0_4 = arith.constant 0 : index
    %4 = vector.load %arg3[%c0_3, %c0_4] : memref<1x128xf32, #tpu.memory_space<vmem>>, vector<1x128xf32>
    %5 = vector.broadcast %4 : vector<1x128xf32> to vector<8x128xf32>
    %6 = arith.addf %3, %5 : vector<8x128xf32>
    %7 = tpu.iota {dimensions = array<i32: 1>} : vector<8x128xi32>
    %c10_i32 = arith.constant 10 : i32
    %8 = vector.broadcast %c10_i32 : i32 to vector<8x128xi32>
    %9 = arith.cmpi slt, %7, %8 : vector<8x128xi32>
    %cst_5 = arith.constant -1.000000e+30 : f32
    %10 = vector.broadcast %cst_5 : f32 to vector<8x128xf32>
    %11 = arith.select %9, %6, %10 : vector<8x128xi1>, vector<8x128xf32>
    %cst_6 = arith.constant dense<0xFF800000> : vector<8xf32>
    %12 = vector.multi_reduction <maximumf>, %11, %cst_6 [1] : vector<8x128xf32> to vector<8xf32>
    %13 = vector.shape_cast %12 : vector<8xf32> to vector<8x1xf32>
    %14 = vector.broadcast %13 : vector<8x1xf32> to vector<8x128xf32>
    %15 = arith.subf %11, %14 : vector<8x128xf32>
    %16 = math.exp %15 : vector<8x128xf32>
    %cst_7 = arith.constant dense<0.000000e+00> : vector<8xf32>
    %17 = vector.multi_reduction <add>, %16, %cst_7 [1] : vector<8x128xf32> to vector<8xf32>
    %18 = vector.shape_cast %17 : vector<8xf32> to vector<8x1xf32>
    %19 = math.log %18 : vector<8x1xf32>
    %20 = vector.broadcast %19 : vector<8x1xf32> to vector<8x128xf32>
    %21 = arith.subf %15, %20 : vector<8x128xf32>
    %c0_8 = arith.constant 0 : index
    %c0_9 = arith.constant 0 : index
    %22 = vector.load %arg4[%c0_8, %c0_9] : memref<8x128xf32, #tpu.memory_space<vmem>>, vector<8x128xf32>
    tpu.vector_store %arg4[%c0_8, %c0_9], %21 {strides = array<i32>} : memref<8x128xf32, #tpu.memory_space<vmem>>, vector<8x128xf32>,
    return
  }
  func.func @transform_0(%arg0: i32) -> (i32, i32) {
    %c0_i32 = arith.constant 0 : i32
    %c0_i32_0 = arith.constant 0 : i32
    return %arg0, %c0_i32 : i32, i32
  }
  func.func @transform_1(%arg0: i32) -> (i32, i32) {
    %c0_i32 = arith.constant 0 : i32
    %c0_i32_0 = arith.constant 0 : i32
    %c0_i32_1 = arith.constant 0 : i32
    return %c0_i32, %c0_i32_0 : i32, i32
  }
  func.func @transform_2(%arg0: i32) -> (i32, i32) {
    %c0_i32 = arith.constant 0 : i32
    %c0_i32_0 = arith.constant 0 : i32
    %c0_i32_1 = arith.constant 0 : i32
    return %c0_i32, %c0_i32_0 : i32, i32
  }
  func.func @transform_3(%arg0: i32) -> (i32, i32) {
    %c0_i32 = arith.constant 0 : i32
    %c0_i32_0 = arith.constant 0 : i32
    return %arg0, %c0_i32 : i32, i32
  }
}

</mosaic_0001>

<bundles_post_ra>
// kernel: tpu_custom_call.1
= control target key start
LH: loop header
LB: loop body
LE: loop exit
PB: predicated region body
PF: predicated region fallthrough
CT: control target
= control target key end

     0   :  { %8 = vsyncpa [#allocation3], 0  ;;  %s980_s0 = inlined_call_operand.hbm [shape: f32[8,784], index: 0, kind: input, shape index: {}]   ;;  %s981_s1 = inlined_call_operand.hbm [shape: bf16[784,128], index: 1, kind: input, shape index: {}]   ;;  %s982_s2 = inlined_call_operand.vmem [shape: f32[1,128], index: 2, kind: input, shape index: {}]   ;;  %s983_s3 = inlined_call_operand.hbm [shape: f32[8,128], index: 3, kind: output, shape index: {}]  }
   0x1   :  { %9 = vsyncpa [#allocation6], 0 }
   0x2   :  { %10 = vsyncpa [#allocation4], 0  ;;  %s907_s12 = smov [#allocation2]   ;;  %s908_s14 = smov [#allocation5]  }
   0x3   :  { %s17_s13 = sshll.u32 %s907_s12, 4  ;;  %s26_s15 = sshll.u32 %s908_s14, 4  ;;  %s18_s13 = int_to_ptr.vmem [resolvable:$true] %s17_s13  ;;  %s934_s15 = int_to_ptr.vmem [resolvable:$true] %s26_s15 }
   0x4   :  { %s835_s18 = scalar_lea.hbm %s980_s0, 896 }
   0x5   :  { %p836_p0 = scmp.ne.s32.totalorder %s980_s0, %s835_s18  ;;  %p839_p1 = scmp.lt.u32.totalorder %s835_s18, %s980_s0 }
   0x7   :  { %p841_p2 = pnand %p839_p1, %p836_p0 }
   0x9   :  { %844 = shalt.err (!%p841_p2)
}
   0xa   :  { %s845_s23 = scalar_lea.vmem %s18_s13, 896  ;;  %p850_p4 = scmp.lt.s32.totalorder %s18_s13, %s18_s13 }
   0xb   :  { %p846_p3 = scmp.ne.s32.totalorder %s18_s13, %s845_s23  ;;  %p851_p5 = scmp.lt.s32.totalorder %s845_s23, %s845_s23 }
   0xd   :  { %p852_p6 = por %p851_p5, %p850_p4 }
   0xf   :  { %p853_p7 = pnand %p852_p6, %p846_p3 }
  0x11   :  { %856 = shalt.err (!%p853_p7)
}
  0x12   :  { %20 = dma.hbm_to_vmem [thread:$0]  %s980_s0, 896, %s18_s13, [#allocation3]  }
  0x13   :  { %s857_s28 = scalar_lea.hbm %s981_s1, 6272 }
  0x14   :  { %p858_p8 = scmp.ne.s32.totalorder %s981_s1, %s857_s28  ;;  %p861_p9 = scmp.lt.u32.totalorder %s857_s28, %s981_s1 }
  0x16   :  { %p863_p10 = pnand %p861_p9, %p858_p8 }
  0x18   :  { %866 = shalt.err (!%p863_p10)
}
  0x19   :  { %s867_s6 = scalar_lea.vmem %s934_s15, 6272  ;;  %p872_p12 = scmp.lt.s32.totalorder %s934_s15, %s934_s15 }
  0x1a   :  { %p868_p11 = scmp.ne.s32.totalorder %s934_s15, %s867_s6  ;;  %p873_p13 = scmp.lt.s32.totalorder %s867_s6, %s867_s6 }
  0x1c   :  { %p874_p0 = por %p873_p13, %p872_p12 }
  0x1e   :  { %p875_p1 = pnand %p874_p0, %p868_p11 }
  0x20   :  { %878 = shalt.err (!%p875_p1)
}
  0x21   :  { %s909_s0 = smov 64   ;;  %s910_s7 = smov 4  }
  0x22   :  { %32 = dma.hbm_to_vmem [thread:$0]  %s981_s1, 6272, %s934_s15, [#allocation6], %s909_s0, %s909_s0, %s910_s7  }
  0x23   :  { %901 = dma.done.wait [#allocation3], 896  }
  0x24   :  { %902 = vsyncadd [#allocation3], 4294966400 }
  0x25   :  { %903 = dma.done.wait [#allocation6], 6272  }
  0x26   :  { %904 = vsyncadd [#allocation6], 4294961024  ;;  %v782_v0 = vld [vmem:[#allocation5 + $0x40] sm:$0xff]   ;;  %v786_v4 = vld [vmem:[#allocation5 + $0x48] sm:$0xff]   ;;  %v911_v44 = vmov 0.0   ;;  %vm912_vm0 = vmmov 0  }
  0x27   :  { %v783_v1 = vld [vmem:[#allocation5] sm:$0xff]   ;;  %701 = vmatprep.subr.bf16.mxu0 %v782_v0  ;;  %v787_v5 = vld [vmem:[#allocation5 + $0x8] sm:$0xff]   ;;  %v790_v8 = vld [vmem:[#allocation5 + $0x50] sm:$0xff]   ;;  %vm455_vm1 = vcmask 130048  }
  0x28   :  { %v784_v2 = vld [vmem:[#allocation5 + $0xc0] sm:$0xff]   ;;  %702 = vmatpush3.bf16.msra.mxu0 %v783_v1  ;;  %v788_v6 = vld [vmem:[#allocation5 + $0xc8] sm:$0xff]   ;;  %v791_v9 = vld [vmem:[#allocation5 + $0x10] sm:$0xff]  }
  0x29   :  { %v785_v3 = vld [vmem:[#allocation5 + $0x80] sm:$0xff]   ;;  %723 = vmatprep.subr.bf16.mxu1 %v784_v2  ;;  %703 = vmatprep.subr.bf16.mxu0 %v786_v4  ;;  %v789_v7 = vld [vmem:[#allocation5 + $0x88] sm:$0xff]   ;;  %v792_v10 = vld [vmem:[#allocation5 + $0xd0] sm:$0xff]  }
  0x2a   :  { %724 = vmatpush3.bf16.msra.mxu1 %v785_v3  ;;  %v793_v11 = vld [vmem:[#allocation5 + $0x90] sm:$0xff]   ;;  %v794_v12 = vld [vmem:[#allocation5 + $0x58] sm:$0xff]   ;;  %v798_v16 = vld [vmem:[#allocation5 + $0x60] sm:$0xff]  }
  0x2b   :  { %725 = vmatprep.subr.bf16.mxu1 %v788_v6  ;;  %v795_v13 = vld [vmem:[#allocation5 + $0x18] sm:$0xff]   ;;  %v799_v17 = vld [vmem:[#allocation5 + $0x20] sm:$0xff]   ;;  %v802_v20 = vld [vmem:[#allocation5 + $0x68] sm:$0xff]  }
  0x2c   :  { %704 = vmatpush3.bf16.msra.mxu0 %v787_v5  ;;  %v796_v14 = vld [vmem:[#allocation5 + $0xd8] sm:$0xff]   ;;  %v800_v18 = vld [vmem:[#allocation5 + $0xe0] sm:$0xff]   ;;  %v803_v21 = vld [vmem:[#allocation5 + $0x28] sm:$0xff]  }
  0x2d   :  { %705 = vmatprep.subr.bf16.mxu0 %v790_v8  ;;  %v797_v15 = vld [vmem:[#allocation5 + $0x98] sm:$0xff]   ;;  %v801_v19 = vld [vmem:[#allocation5 + $0xa0] sm:$0xff]   ;;  %v804_v22 = vld [vmem:[#allocation5 + $0xe8] sm:$0xff]  }
  0x2e   :  { %726 = vmatpush3.bf16.msra.mxu1 %v789_v7  ;;  %v805_v23 = vld [vmem:[#allocation5 + $0xa8] sm:$0xff]   ;;  %v806_v24 = vld [vmem:[#allocation5 + $0x70] sm:$0xff]   ;;  %v810_v28 = vld [vmem:[#allocation5 + $0x78] sm:$0xff]  }
  0x2f   :  { %727 = vmatprep.subr.bf16.mxu1 %v792_v10  ;;  %v807_v25 = vld [vmem:[#allocation5 + $0x30] sm:$0xff]   ;;  %v811_v29 = vld [vmem:[#allocation5 + $0x38] sm:$0xff]   ;;  %v42_v34 = vld [vmem:[#allocation2] sm:$0xff] }
  0x30   :  { %706 = vmatpush3.bf16.msra.mxu0 %v791_v9  ;;  %v808_v26 = vld [vmem:[#allocation5 + $0xf0] sm:$0xff]   ;;  %v812_v30 = vld [vmem:[#allocation5 + $0xf8] sm:$0xff]   ;;  %v49_v35 = vpack.c.bf16 %v42_v34, %v42_v34  ;;  %v814_v36 = vld [vmem:[#allocation5 + $0x140] sm:$0xff]  }
  0x31   :  { %707 = vmatprep.subr.bf16.mxu0 %v794_v12  ;;  %v809_v27 = vld [vmem:[#allocation5 + $0xb0] sm:$0xff]   ;;  %v813_v33 = vld [vmem:[#allocation5 + $0xb8] sm:$0xff]   ;;  %v45_v37 = vld [vmem:[#allocation2 + $0x18] sm:$0xff] }
  0x32   :  { %728 = vmatpush3.bf16.msra.mxu1 %v793_v11  ;;  %v43_v31 = vld [vmem:[#allocation2 + $0x8] sm:$0xff]  ;;  %v52_v38 = vpack.c.bf16 %v45_v37, %v45_v37  ;;  %v815_v39 = vld [vmem:[#allocation5 + $0x100] sm:$0xff]   ;;  %v44_v40 = vld [vmem:[#allocation2 + $0x10] sm:$0xff] }
  0x33   :  { %729 = vmatprep.subr.bf16.mxu1 %v796_v14  ;;  %v50_v32 = vpack.c.bf16 %v43_v31, %v43_v31  ;;  %v51_v41 = vpack.c.bf16 %v44_v40, %v44_v40  ;;  %v816_v42 = vld [vmem:[#allocation5 + $0x148] sm:$0xff]   ;;  %v818_v45 = vld [vmem:[#allocation5 + $0x150] sm:$0xff]   ;;  %v820_v47 = vld [vmem:[#allocation5 + $0x158] sm:$0xff]  }
  0x34   :  { %708 = vmatpush3.bf16.msra.mxu0 %v795_v13  ;;  %531 = vmatprep.mubr.bf16.mxu1 %v52_v38  ;;  %v817_v43 = vld [vmem:[#allocation5 + $0x108] sm:$0xff]   ;;  %v819_v46 = vld [vmem:[#allocation5 + $0x110] sm:$0xff]   ;;  %v821_v48 = vld [vmem:[#allocation5 + $0x118] sm:$0xff]  }
  0x35   :  { %709 = vmatprep.subr.bf16.mxu0 %v798_v16  ;;  %491 = vmatprep.mubr.bf16.mxu0 %v50_v32  ;;  %v822_v49 = vld [vmem:[#allocation5 + $0x160] sm:$0xff]   ;;  %v824_v51 = vld [vmem:[#allocation5 + $0x168] sm:$0xff]   ;;  %v47_v53 = vld [vmem:[#allocation2 + $0x28] sm:$0xff] }
  0x36   :  { %730 = vmatpush3.bf16.msra.mxu1 %v797_v15  ;;  %v823_v50 = vld [vmem:[#allocation5 + $0x120] sm:$0xff]   ;;  %v54_v54 = vpack.c.bf16 %v47_v53, %v47_v53  ;;  %v48_v55 = vld [vmem:[#allocation2 + $0x30] sm:$0xff]  ;;  %v825_v56 = vld [vmem:[#allocation5 + $0x128] sm:$0xff]  }
  0x37   :  { %731 = vmatprep.subr.bf16.mxu1 %v800_v18  ;;  %v830_v52 = vld [vmem:[#allocation5 + $0x180] sm:$0xff]   ;;  %v55_v57 = vpack.c.bf16 %v48_v55, %v48_v55  ;;  %v826_v58 = vld [vmem:[#allocation5 + $0x170] sm:$0xff]   ;;  %v828_v60 = vld [vmem:[#allocation5 + $0x178] sm:$0xff]  }
  0x38   :  { %710 = vmatpush3.bf16.msra.mxu0 %v799_v17  ;;  %v827_v59 = vld [vmem:[#allocation5 + $0x130] sm:$0xff]   ;;  %v829_v61 = vld [vmem:[#allocation5 + $0x138] sm:$0xff]   ;;  %v46_v62 = vld [vmem:[#allocation2 + $0x20] sm:$0xff]  ;;  %v619_v17 = vlaneseq }
  0x39   :  { %711 = vmatprep.subr.bf16.mxu0 %v802_v20  ;;  %v53_v63 = vpack.c.bf16 %v46_v62, %v46_v62  ;;  %v650_v1 = vld [vmem:[%s982_s2] ss:$0 sm:$0xff]  ;;  %s913_s2 = smov [#allocation7]  }
  0x3a   :  { %732 = vmatpush3.bf16.msra.mxu1 %v801_v19  ;;  %v620_v20 = vand.u32 127, %v619_v17  ;;  %s640_s11 = sshll.u32 %s913_s2, 4  ;;  %s641_s11 = int_to_ptr.vmem [resolvable:$true] %s640_s11 }
  0x3b   :  { %733 = vmatprep.subr.bf16.mxu1 %v804_v22  ;;  %s879_s12 = scalar_lea.vmem %s641_s11, 128  ;;  %p884_p3 = scmp.lt.s32.totalorder %s641_s11, %s641_s11 }
  0x3c   :  { %712 = vmatpush3.bf16.msra.mxu0 %v803_v21  ;;  %vm621_vm2 = vcmp.lt.s32.totalorder %v620_v20, 10  ;;  %p880_p2 = scmp.ne.s32.totalorder %s641_s11, %s879_s12  ;;  %p885_p4 = scmp.lt.s32.totalorder %s879_s12, %s879_s12 }
  0x3d   :  { %713 = vmatprep.subr.bf16.mxu0 %v806_v24 }
  0x3e   :  { %734 = vmatpush3.bf16.msra.mxu1 %v805_v23  ;;  %p886_p5 = por %p885_p4, %p884_p3 }
  0x3f   :  { %735 = vmatprep.subr.bf16.mxu1 %v808_v26 }
  0x40   :  { %714 = vmatpush3.bf16.msra.mxu0 %v807_v25  ;;  %p887_p6 = pnand %p886_p5, %p880_p2 }
  0x41   :  { %715 = vmatprep.subr.bf16.mxu0 %v810_v28 }
  0x42   :  { %736 = vmatpush3.bf16.msra.mxu1 %v809_v27 }
  0x43   :  { %737 = vmatprep.subr.bf16.mxu1 %v812_v30 }
  0x44   :  { %716 = vmatpush3.bf16.msra.mxu0 %v811_v29 }
  0x45   :  { %745 = vmatprep.subr.bf16.mxu0 %v814_v36 }
  0x46   :  { %738 = vmatpush3.bf16.msra.mxu1 %v813_v33 }
  0x47   :  { %492 = vmatmul.mubr.bf16.vlgmr.msra.gmra.mrb[0].mxu0 %v49_v35  ;;  %769 = vmatprep.subr.bf16.mxu1 %v911_v44 }
  0x48   :  { %746 = vmatpush3.bf16.msra.mxu0 %v815_v39  ;;  %571 = vmatprep.mubr.bf16.mxu0 %v54_v54 }
  0x49   :  { %532 = vmatmul.mubr.bf16.vlgmr.msra.gmra.mrb[0].mxu1 %v51_v41  ;;  %747 = vmatprep.subr.bf16.mxu0 %v816_v42 }
  0x4a   :  { %771 = vmatprep.mubr.msk.bf16.mxu1 %vm912_vm0, %v911_v44  ;;  %770 = vmatpush3.bf16.msra.mxu1 %v830_v52 }
  0x4c   :  { %748 = vmatpush3.bf16.msra.mxu0 %v817_v43 }
  0x4d   :  { %749 = vmatprep.subr.bf16.mxu0 %v818_v45 }
  0x50   :  { %750 = vmatpush3.bf16.msra.mxu0 %v819_v46 }
  0x51   :  { %751 = vmatprep.subr.bf16.mxu0 %v820_v47  ;;  %772 = vmatmul.mubr.msk.bf16.vlgmr.msra.gmra.mrb[4].mxu1 %vm455_vm1, %v55_v57 }
  0x54   :  { %752 = vmatpush3.bf16.msra.mxu0 %v821_v48 }
  0x55   :  { %753 = vmatprep.subr.bf16.mxu0 %v822_v49 }
  0x58   :  { %754 = vmatpush3.bf16.msra.mxu0 %v823_v50 }
  0x59   :  { %755 = vmatprep.subr.bf16.mxu0 %v824_v51 }
  0x5c   :  { %756 = vmatpush3.bf16.msra.mxu0 %v825_v56 }
  0x5d   :  { %757 = vmatprep.subr.bf16.mxu0 %v826_v58 }
  0x60   :  { %758 = vmatpush3.bf16.msra.mxu0 %v827_v59 }
  0x61   :  { %759 = vmatprep.subr.bf16.mxu0 %v828_v60 }
  0x64   :  { %760 = vmatpush3.bf16.msra.mxu0 %v829_v61 }
  0x67   :  { %572 = vmatmul.mubr.bf16.vlgmr.msra.gmra.mrb[4].mxu0 %v53_v63 }
 0x11a   :  { %v717_v0 = vpop.f32.mrb[0].mxu0 }
 0x11b   :  { %v718_v2 = vpop.f32.mrb[1].mxu0 }
 0x11c   :  { %v719_v3 = vadd.f32 %v718_v2, %v717_v0  ;;  %v720_v4 = vpop.f32.mrb[2].mxu0  ;;  %v739_v5 = vpop.f32.mrb[0].mxu1 }
 0x11d   :  { %v721_v6 = vpop.f32.mrb[3].mxu0  ;;  %v740_v8 = vpop.f32.mrb[1].mxu1 }
 0x11e   :  { %v494_v7 = vadd.f32 %v719_v3, %v650_v1  ;;  %v741_v9 = vadd.f32 %v740_v8, %v739_v5  ;;  %v742_v10 = vpop.f32.mrb[2].mxu1 }
 0x11f   :  { %v743_v11 = vpop.f32.mrb[3].mxu1 }
 0x120   :  { %v534_v12 = vadd.f32 %v741_v9, %v494_v7 }
 0x124   :  { %v613_v13 = vpop.f32.mrb[4].mxu1 }
 0x125   :  { %v773_v14 = vpop.f32.mrb[5].mxu1 }
 0x126   :  { %v616_v15 = vpop.f32.mrb[6].mxu1 }
 0x127   :  { %v774_v16 = vpop.f32.mrb[7].mxu1 }
 0x13a   :  { %v761_v18 = vpop.f32.mrb[4].mxu0 }
 0x13b   :  { %v762_v19 = vpop.f32.mrb[5].mxu0 }
 0x13c   :  { %v763_v21 = vadd.f32 %v762_v19, %v761_v18  ;;  %v764_v22 = vpop.f32.mrb[6].mxu0 }
 0x13d   :  { %v765_v23 = vpop.f32.mrb[7].mxu0 }
 0x13e   :  { %v574_v24 = vadd.f32 %v763_v21, %v534_v12 }
 0x140   :  { %v614_v25 = vadd.f32 %v613_v13, %v574_v24 }
 0x142   :  { %v622_v26 = vsel %vm621_vm2, %v614_v25, -1e+30 }
 0x143   :  { %623 = vmax.xlane.f32.xlu0 %v622_v26 }
 0x1d0   :  { %v624_v27 = vpop.xlane.xlu0 %623 }
 0x1d1   :  { %v625_v28 = vsub.f32 %v622_v26, %v624_v27 }
 0x1d3   :  { %v626_v29 = vmul.f32 1.442695, %v625_v28 }
 0x1d5   :  { %831 = vpow2.f32 %v626_v29 }
 0x1df   :  { %v832_v30 = vpop.eup %831 }
 0x1e0   :  { %628 = vadd.xlane.f32.xlu0 %v832_v30 }
 0x26d   :  { %v629_v31 = vpop.xlane.xlu0 %628 }
 0x26e   :  { %833 = vlog2.f32 %v629_v31 }
 0x278   :  { %v834_v32 = vpop.eup %833 }
 0x279   :  { %v631_v33 = vmul.f32 0.6931472, %v834_v32 }
 0x27b   :  { %v632_v34 = vsub.f32 %v625_v28, %v631_v33 }
 0x27d   :  { %633 = vst [vmem:[#allocation7] sm:$0xff] %v632_v34 }
 0x27e   :  { %890 = shalt.err (!%p887_p6)
}
 0x27f   :  { %s891_s15 = scalar_lea.hbm %s983_s3, 128 }
 0x280   :  { %p892_p7 = scmp.ne.s32.totalorder %s983_s3, %s891_s15  ;;  %p895_p8 = scmp.lt.u32.totalorder %s891_s15, %s983_s3 }
 0x282   :  { %p897_p9 = pnand %p895_p8, %p892_p7 }
 0x284   :  { %900 = shalt.err (!%p897_p9)
}
 0x285   :  { %643 = dma.vmem_to_hbm [thread:$0]  %s641_s11, 128, %s983_s3, [#allocation4]  }
 0x286   :  { %905 = dma.done.wait [#allocation4], 128  }
 0x287   :  { %906 = vsyncadd [#allocation4], 4294967168 }
 0x288   :  { %647 = vsyncpa [#allocation3], 1 }
 0x289   :  { %648 = vsyncpa [#allocation6], 1 }
 0x28a   :  { %649 = vsyncpa [#allocation4], 1 }

</bundles_post_ra>
